<compile_context>
chip_gen: v5e
topology: v5e:2x2
jax: 0.10.0
libtpu: 0.0.40
codegen_flags: <defaults>
</compile_context>

<pallas_src>
import functools

import jax
import jax.numpy as jnp
from jax.experimental import pallas as pl
from jax.experimental.pallas import tpu as pltpu


def _round_up(n, m):
    return ((n + m - 1) // m) * m


def qnetwork_kernel(x_ref,
                    w1_ref, b1_ref,
                    w2_ref, b2_ref,
                    wva_ref, bva_ref,
                    wq_ref, bq_ref,
                    q_ref, *, mxu_dtype, compute_dtype):
    """One batch tile of the dueling-DQN forward pass (4 matmuls, 3 ReLUs)."""
    x = x_ref[...]

    # fc1 + ReLU (MXU f32 accumulation; bias/ReLU in compute_dtype on the VPU).
    h1 = jnp.dot(x.astype(mxu_dtype), w1_ref[...],
                 preferred_element_type=jnp.float32)
    h1 = jnp.maximum(h1.astype(compute_dtype) + b1_ref[...], 0)

    # fc2 + ReLU
    h2 = jnp.dot(h1.astype(mxu_dtype), w2_ref[...],
                 preferred_element_type=jnp.float32)
    h2 = jnp.maximum(h2.astype(compute_dtype) + b2_ref[...], 0)

    # Fused fc_value | fc_adv trunk + ReLU:  hva[:, :L4] == hv, hva[:, L4:] == ha.
    hva = jnp.dot(h2.astype(mxu_dtype), wva_ref[...],
                  preferred_element_type=jnp.float32)
    hva = jnp.maximum(hva.astype(compute_dtype) + bva_ref[...], 0)

    # Entire dueling combination folded into one linear layer (see wrapper).
    q = jnp.dot(hva.astype(mxu_dtype), wq_ref[...],
                preferred_element_type=jnp.float32) + bq_ref[...]
    q_ref[...] = q.astype(q_ref.dtype)


@functools.partial(jax.jit, static_argnames=("block_b_max", "min_steps",
                                              "mxu_dtype", "compute_dtype"))
def qnetwork_forward(x, params, *, block_b_max=2048, min_steps=2,
                     mxu_dtype=jnp.bfloat16, compute_dtype=jnp.float32):
    """x: (B, L1) float32. params: dict from init_params (weights as (in, out)).

    mxu_dtype:     matmul operand dtype (bf16 default; f32 accumulation kept).
    compute_dtype: bias+ReLU dtype (f32 default = safe on v5e; use bf16 on
                   v6e/v7x to halve VALU passes / vreg spills).
    """
    B, L1 = x.shape
    L2 = params["w1"].shape[1]
    L3 = params["w2"].shape[1]
    L4 = params["wv"].shape[1]
    L5 = params["wadv"].shape[1]
    f32 = jnp.float32

    # ---- batch tiling ----------------------------------------------------
    block_b_max = max(8, (block_b_max // 8) * 8)       # defensive (8,128) align
    if B <= 8:
        block_b = B                                     # full-extent block
    else:
        target = -(-B // max(1, min_steps))             # >= min_steps grid steps
        block_b = min(block_b_max, _round_up(target, 8))
    grid = (-(-B // block_b),)                          # ragged last block is OK

    # ---- weight prep (tiny arrays, exact fusion of the dueling head) ------
    wva = jnp.concatenate([params["wv"], params["wa"]], axis=1)          # (L3, 2L4)
    bva = jnp.concatenate([params["bv"], params["ba"]], axis=1)          # (1, 2L4)
    wval_col = jnp.concatenate([params["wval"],
                                jnp.zeros((L4, 1), f32)], axis=0)        # (2L4, 1)
    wadv_pad = jnp.concatenate([jnp.zeros((L4, L5), f32),
                                params["wadv"]], axis=0)                 # (2L4, L5)
    # Q = value + adv - mean(adv) is linear in hva -> fold into one layer.
    wq = wadv_pad + (wval_col - jnp.mean(wadv_pad, axis=1, keepdims=True))
    bq = params["badv"] + params["bval"] - jnp.mean(params["badv"])      # (1, L5)

    w1 = params["w1"].astype(mxu_dtype)
    w2 = params["w2"].astype(mxu_dtype)
    wva = wva.astype(mxu_dtype)
    wq = wq.astype(mxu_dtype)
    b1 = params["b1"].astype(compute_dtype)
    b2 = params["b2"].astype(compute_dtype)
    bva = bva.astype(compute_dtype)
    bq = bq.astype(f32)                                  # final bias stays f32

    const = lambda shape: pl.BlockSpec(shape, lambda i: (0, 0))  # resident weights
    grid_spec = pl.GridSpec(
        grid=grid,
        in_specs=[
            pl.BlockSpec((block_b, L1), lambda i: (i, 0)),   # x tile
            const((L1, L2)), const((1, L2)),                 # fc1
            const((L2, L3)), const((1, L3)),                 # fc2
            const((L3, 2 * L4)), const((1, 2 * L4)),         # fused trunk
            const((2 * L4, L5)), const((1, L5)),             # folded dueling head
        ],
        out_specs=pl.BlockSpec((block_b, L5), lambda i: (i, 0)),
    )
    # TODO(synk): lane-dense Q store ((B//16,128)-packed or (L5,B)-transposed)
    # needs an in-kernel relayout (Mosaic reshape/transpose); kept row-major for now.

    return pl.pallas_call(
        functools.partial(qnetwork_kernel, mxu_dtype=mxu_dtype,
                          compute_dtype=compute_dtype),
        out_shape=jax.ShapeDtypeStruct((B, L5), jnp.float32),
        grid_spec=grid_spec,
        compiler_params=pltpu.CompilerParams(
            dimension_semantics=("parallel",),
            vmem_limit_bytes=32 * 1024 * 1024),
    )(x, w1, b1, w2, b2, wva, bva, wq, bq)


def init_params(key, l1, l2, l3, l4, l5):
    """nn.Linear-style init: U(-1/sqrt(fan_in), +1/sqrt(fan_in)); weights (in, out)."""
    def linear(key, fan_in, fan_out):
        kw, kb = jax.random.split(key)
        bound = 1.0 / jnp.sqrt(jnp.float32(fan_in))
        w = jax.random.uniform(kw, (fan_in, fan_out), jnp.float32, -bound, bound)
        b = jax.random.uniform(kb, (1, fan_out), jnp.float32, -bound, bound)
        return w, b

    keys = jax.random.split(key, 6)
    w1, b1 = linear(keys[0], l1, l2)
    w2, b2 = linear(keys[1], l2, l3)
    wv, bv = linear(keys[2], l3, l4)
    wa, ba = linear(keys[3], l3, l4)
    wval, bval = linear(keys[4], l4, 1)
    wadv, badv = linear(keys[5], l4, l5)
    return dict(w1=w1, b1=b1, w2=w2, b2=b2, wv=wv, bv=bv, wa=wa, ba=ba,
                wval=wval, bval=bval, wadv=wadv, badv=badv)


def qnetwork_ref(x, p):
    """Pure-JAX reference (same math as the PyTorch module)."""
    h1 = jax.nn.relu(x @ p["w1"] + p["b1"])
    h2 = jax.nn.relu(h1 @ p["w2"] + p["b2"])
    hv = jax.nn.relu(h2 @ p["wv"] + p["bv"])
    ha = jax.nn.relu(h2 @ p["wa"] + p["ba"])
    value = hv @ p["wval"] + p["bval"]
    adv = ha @ p["wadv"] + p["badv"]
    return value + adv - jnp.mean(adv, axis=1, keepdims=True)


if __name__ == "__main__":
    # Small shapes consistent with QNetwork(l1, l2, l3, l4, l5).
    L1, L2, L3, L4, L5 = 32, 64, 64, 32, 8

    key = jax.random.PRNGKey(0)
    kp, kx1, kx2 = jax.random.split(key, 3)
    params = init_params(kp, L1, L2, L3, L4, L5)

    # Strict f32-MXU check; 8-aligned batch, split into 2 grid steps (v7x path).
    B1 = 96
    x1 = jax.random.normal(kx1, (B1, L1), jnp.float32)
    q1 = jax.block_until_ready(qnetwork_forward(x1, params, mxu_dtype=jnp.float32))
    ref1 = qnetwork_ref(x1, params)
    assert q1.shape == (B1, L5)
    assert jnp.allclose(q1, ref1, atol=1e-4, rtol=1e-4), "f32 mismatch vs reference"

    # Default path (bf16 MXU operands, f32 accumulation / elementwise) with a
    # ragged batch exercising the clipped boundary block (no wrapper-side pad).
    B2 = 50
    x2 = jax.random.normal(kx2, (B2, L1), jnp.float32)
    q2 = jax.block_until_ready(qnetwork_forward(x2, params))
    ref2 = qnetwork_ref(x2, params)
    assert q2.shape == (B2, L5)
    assert jnp.allclose(q2, ref2, atol=1e-1, rtol=1e-1), "bf16 mismatch vs reference"

    print("KERNEL_OK")
</pallas_src>

<mosaic_0001>
module attributes {stable_mosaic.version = 11 : i64} {
  func.func @qnetwork_kernel(%arg0: i32, %arg1: memref<48x32xf32, #tpu.memory_space<vmem>>, %arg2: memref<32x64xf32, #tpu.memory_space<vmem>>, %arg3: memref<1x64xf32, #tpu.memory_space<vmem>>, %arg4: memref<64x64xf32, #tpu.memory_space<vmem>>, %arg5: memref<1x64xf32, #tpu.memory_space<vmem>>, %arg6: memref<64x64xf32, #tpu.memory_space<vmem>>, %arg7: memref<1x64xf32, #tpu.memory_space<vmem>>, %arg8: memref<64x8xf32, #tpu.memory_space<vmem>>, %arg9: memref<1x8xf32, #tpu.memory_space<vmem>>, %arg10: memref<48x8xf32, #tpu.memory_space<vmem>>) attributes {dimension_semantics = [#tpu.dimension_semantics<parallel>], iteration_bounds = array<i64: 2>, scalar_prefetch = 0 : i64, scratch_operands = 0 : i64, tpu.core_type = #tpu.core_type<tc>, window_params = [{transform_indices = @transform_0, window_bounds = array<i64: 48, 32>}, {pipeline_mode = #tpu.pipeline_mode<synchronous>, transform_indices = @transform_1, window_bounds = array<i64: 32, 64>}, {pipeline_mode = #tpu.pipeline_mode<synchronous>, transform_indices = @transform_2, window_bounds = array<i64: 1, 64>}, {pipeline_mode = #tpu.pipeline_mode<synchronous>, transform_indices = @transform_3, window_bounds = array<i64: 64, 64>}, {pipeline_mode = #tpu.pipeline_mode<synchronous>, transform_indices = @transform_4, window_bounds = array<i64: 1, 64>}, {pipeline_mode = #tpu.pipeline_mode<synchronous>, transform_indices = @transform_5, window_bounds = array<i64: 64, 64>}, {pipeline_mode = #tpu.pipeline_mode<synchronous>, transform_indices = @transform_6, window_bounds = array<i64: 1, 64>}, {pipeline_mode = #tpu.pipeline_mode<synchronous>, transform_indices = @transform_7, window_bounds = array<i64: 64, 8>}, {pipeline_mode = #tpu.pipeline_mode<synchronous>, transform_indices = @transform_8, window_bounds = array<i64: 1, 8>}, {transform_indices = @transform_9, window_bounds = array<i64: 48, 8>}]} {
    %c0 = arith.constant 0 : index
    %c0_0 = arith.constant 0 : index
    %0 = vector.load %arg1[%c0, %c0_0] : memref<48x32xf32, #tpu.memory_space<vmem>>, vector<48x32xf32>
    %c0_1 = arith.constant 0 : index
    %c0_2 = arith.constant 0 : index
    %1 = vector.load %arg2[%c0_1, %c0_2] : memref<32x64xf32, #tpu.memory_space<vmem>>, vector<32x64xf32>
    %cst = arith.constant dense<0.000000e+00> : vector<48x64xf32>
    %2 = tpu.matmul %0, %1, %cst {dimension_numbers = #tpu.dot_dimension_numbers<[1], [0], [0], [1], [0, 0, 1, 1], [], []>} : vector<48x32xf32>, vector<32x64xf32>, vector<48x64xf32> -> vector<48x64xf32>
    %c0_3 = arith.constant 0 : index
    %c0_4 = arith.constant 0 : index
    %3 = vector.load %arg3[%c0_3, %c0_4] : memref<1x64xf32, #tpu.memory_space<vmem>>, vector<1x64xf32>
    %4 = vector.broadcast %3 : vector<1x64xf32> to vector<48x64xf32>
    %5 = arith.addf %2, %4 : vector<48x64xf32>
    %cst_5 = arith.constant 0.000000e+00 : f32
    %6 = vector.broadcast %cst_5 : f32 to vector<48x64xf32>
    %7 = arith.maximumf %5, %6 : vector<48x64xf32>
    %c0_6 = arith.constant 0 : index
    %c0_7 = arith.constant 0 : index
    %8 = vector.load %arg4[%c0_6, %c0_7] : memref<64x64xf32, #tpu.memory_space<vmem>>, vector<64x64xf32>
    %cst_8 = arith.constant dense<0.000000e+00> : vector<48x64xf32>
    %9 = tpu.matmul %7, %8, %cst_8 {dimension_numbers = #tpu.dot_dimension_numbers<[1], [0], [0], [1], [0, 0, 1, 1], [], []>} : vector<48x64xf32>, vector<64x64xf32>, vector<48x64xf32> -> vector<48x64xf32>
    %c0_9 = arith.constant 0 : index
    %c0_10 = arith.constant 0 : index
    %10 = vector.load %arg5[%c0_9, %c0_10] : memref<1x64xf32, #tpu.memory_space<vmem>>, vector<1x64xf32>
    %11 = vector.broadcast %10 : vector<1x64xf32> to vector<48x64xf32>
    %12 = arith.addf %9, %11 : vector<48x64xf32>
    %cst_11 = arith.constant 0.000000e+00 : f32
    %13 = vector.broadcast %cst_11 : f32 to vector<48x64xf32>
    %14 = arith.maximumf %12, %13 : vector<48x64xf32>
    %c0_12 = arith.constant 0 : index
    %c0_13 = arith.constant 0 : index
    %15 = vector.load %arg6[%c0_12, %c0_13] : memref<64x64xf32, #tpu.memory_space<vmem>>, vector<64x64xf32>
    %cst_14 = arith.constant dense<0.000000e+00> : vector<48x64xf32>
    %16 = tpu.matmul %14, %15, %cst_14 {dimension_numbers = #tpu.dot_dimension_numbers<[1], [0], [0], [1], [0, 0, 1, 1], [], []>} : vector<48x64xf32>, vector<64x64xf32>, vector<48x64xf32> -> vector<48x64xf32>
    %c0_15 = arith.constant 0 : index
    %c0_16 = arith.constant 0 : index
    %17 = vector.load %arg7[%c0_15, %c0_16] : memref<1x64xf32, #tpu.memory_space<vmem>>, vector<1x64xf32>
    %18 = vector.broadcast %17 : vector<1x64xf32> to vector<48x64xf32>
    %19 = arith.addf %16, %18 : vector<48x64xf32>
    %cst_17 = arith.constant 0.000000e+00 : f32
    %20 = vector.broadcast %cst_17 : f32 to vector<48x64xf32>
    %21 = arith.maximumf %19, %20 : vector<48x64xf32>
    %c0_18 = arith.constant 0 : index
    %c0_19 = arith.constant 0 : index
    %22 = vector.load %arg8[%c0_18, %c0_19] : memref<64x8xf32, #tpu.memory_space<vmem>>, vector<64x8xf32>
    %cst_20 = arith.constant dense<0.000000e+00> : vector<48x8xf32>
    %23 = tpu.matmul %21, %22, %cst_20 {dimension_numbers = #tpu.dot_dimension_numbers<[1], [0], [0], [1], [0, 0, 1, 1], [], []>} : vector<48x64xf32>, vector<64x8xf32>, vector<48x8xf32> -> vector<48x8xf32>
    %c0_21 = arith.constant 0 : index
    %c0_22 = arith.constant 0 : index
    %24 = vector.load %arg9[%c0_21, %c0_22] : memref<1x8xf32, #tpu.memory_space<vmem>>, vector<1x8xf32>
    %25 = vector.broadcast %24 : vector<1x8xf32> to vector<48x8xf32>
    %26 = arith.addf %23, %25 : vector<48x8xf32>
    %c0_23 = arith.constant 0 : index
    %c0_24 = arith.constant 0 : index
    %27 = vector.load %arg10[%c0_23, %c0_24] : memref<48x8xf32, #tpu.memory_space<vmem>>, vector<48x8xf32>
    tpu.vector_store %arg10[%c0_23, %c0_24], %26 {strides = array<i32>} : memref<48x8xf32, #tpu.memory_space<vmem>>, vector<48x8xf32>,
    return
  }
  func.func @transform_0(%arg0: i32) -> (i32, i32) {
    %c0_i32 = arith.constant 0 : i32
    %c0_i32_0 = arith.constant 0 : i32
    return %arg0, %c0_i32 : i32, i32
  }
  func.func @transform_1(%arg0: i32) -> (i32, i32) {
    %c0_i32 = arith.constant 0 : i32
    %c0_i32_0 = arith.constant 0 : i32
    %c0_i32_1 = arith.constant 0 : i32
    return %c0_i32, %c0_i32_0 : i32, i32
  }
  func.func @transform_2(%arg0: i32) -> (i32, i32) {
    %c0_i32 = arith.constant 0 : i32
    %c0_i32_0 = arith.constant 0 : i32
    %c0_i32_1 = arith.constant 0 : i32
    return %c0_i32, %c0_i32_0 : i32, i32
  }
  func.func @transform_3(%arg0: i32) -> (i32, i32) {
    %c0_i32 = arith.constant 0 : i32
    %c0_i32_0 = arith.constant 0 : i32
    %c0_i32_1 = arith.constant 0 : i32
    return %c0_i32, %c0_i32_0 : i32, i32
  }
  func.func @transform_4(%arg0: i32) -> (i32, i32) {
    %c0_i32 = arith.constant 0 : i32
    %c0_i32_0 = arith.constant 0 : i32
    %c0_i32_1 = arith.constant 0 : i32
    return %c0_i32, %c0_i32_0 : i32, i32
  }
  func.func @transform_5(%arg0: i32) -> (i32, i32) {
    %c0_i32 = arith.constant 0 : i32
    %c0_i32_0 = arith.constant 0 : i32
    %c0_i32_1 = arith.constant 0 : i32
    return %c0_i32, %c0_i32_0 : i32, i32
  }
  func.func @transform_6(%arg0: i32) -> (i32, i32) {
    %c0_i32 = arith.constant 0 : i32
    %c0_i32_0 = arith.constant 0 : i32
    %c0_i32_1 = arith.constant 0 : i32
    return %c0_i32, %c0_i32_0 : i32, i32
  }
  func.func @transform_7(%arg0: i32) -> (i32, i32) {
    %c0_i32 = arith.constant 0 : i32
    %c0_i32_0 = arith.constant 0 : i32
    %c0_i32_1 = arith.constant 0 : i32
    return %c0_i32, %c0_i32_0 : i32, i32
  }
  func.func @transform_8(%arg0: i32) -> (i32, i32) {
    %c0_i32 = arith.constant 0 : i32
    %c0_i32_0 = arith.constant 0 : i32
    %c0_i32_1 = arith.constant 0 : i32
    return %c0_i32, %c0_i32_0 : i32, i32
  }
  func.func @transform_9(%arg0: i32) -> (i32, i32) {
    %c0_i32 = arith.constant 0 : i32
    %c0_i32_0 = arith.constant 0 : i32
    return %arg0, %c0_i32 : i32, i32
  }
}

</mosaic_0001>

<bundles_post_ra>
// kernel: qnetwork_forward.1
= control target key start
LH: loop header
LB: loop body
LE: loop exit
PB: predicated region body
PF: predicated region fallthrough
CT: control target
= control target key end

     0   :  { %s784_s30 = smov 0   ;;  %s934_s0 = inlined_call_operand.vmem [shape: f32[96,32], index: 0, kind: input, shape index: {}]   ;;  %s935_s1 = inlined_call_operand.vmem [shape: f32[32,64], index: 1, kind: input, shape index: {}]   ;;  %s936_s2 = inlined_call_operand.vmem [shape: f32[1,64], index: 2, kind: input, shape index: {}]   ;;  %s937_s3 = inlined_call_operand.vmem [shape: f32[64,64], index: 3, kind: input, shape index: {}]   ;;  %s938_s4 = inlined_call_operand.vmem [shape: f32[1,64], index: 4, kind: input, shape index: {}]   ;;  %s939_s5 = inlined_call_operand.vmem [shape: f32[64,64], index: 5, kind: input, shape index: {}]   ;;  %s940_s6 = inlined_call_operand.vmem [shape: f32[1,64], index: 6, kind: input, shape index: {}]   ;;  %s941_s7 = inlined_call_operand.vmem [shape: f32[64,8], index: 7, kind: input, shape index: {}]   ;;  %s942_s8 = inlined_call_operand.vmem [shape: f32[1,8], index: 8, kind: input, shape index: {}]   ;;  %s943_s9 = inlined_call_operand.vmem [shape: f32[96,8], index: 9, kind: output, shape index: {}]  }
   0x1 LB: > { %s681_s10 = sadd.s32 4294967295, %s732_s30   ;;  %p685_p0 = scmp.ge.s32.totalorder %s732_s30, 1  ;;  %s732_s30 = sphi %s784_s30, %s19_s30  }
   0x2   : > { %p288_p1 = scmp.lt.s32.totalorder %s732_s30, 3 }
   0x4   : > { %p289_p2 = pnand %p685_p0, %p288_p1 }
   0x5   : > { %s324_s15 = smul.u32 (!%p289_p2), 6, %s681_s10 }
   0x6   : > { %292 = sbr.rel (%p289_p2) target bundleno = 590 (0x24e), region = 56 }
   0x7   : > { %p325_p3 = scmp.lt.s32.totalorder (!%p289_p2), %s324_s15, 11 }
   0xb   : > { %v345_v0 = vld [vmem:[%s935_s1 + $0x18] sm:$0xff]  ;;  %v344_v1 = vld [vmem:[%s935_s1 + $0x10] sm:$0xff]  ;;  %v343_v2 = vld [vmem:[%s935_s1 + $0x8] sm:$0xff]  ;;  %s945_s15 = smov (!%p325_p3, %s324_s15), 11  ;;  %vm350_vm0 = vcmask 261120   ;;  %vm422_vm1 = vcmask 523264  }
   0xc   : > { %381 = vmatpush.msra.mxu0 %v345_v0  ;;  %v342_v3 = vld [vmem:[%s935_s1] sm:$0xff]  ;;  %s686_s20 = sshll.u32 %s945_s15, 3  ;;  %v417_v6 = vld [vmem:[%s937_s3 + $0x38] sm:$0xff]  ;;  %v416_v7 = vld [vmem:[%s937_s3 + $0x30] sm:$0xff]  ;;  %vm618_vm2 = vcmask 64512  }
   0xd   : > { %s328_s23 = scalar_lea.vmem %s934_s0, %s686_s20  ;;  %449 = vmatpush.msra.mxu1 %v417_v6  ;;  %v415_v8 = vld [vmem:[%s937_s3 + $0x28] sm:$0xff]  ;;  %v414_v9 = vld [vmem:[%s937_s3 + $0x20] sm:$0xff]  ;;  %v413_v11 = vld [vmem:[%s937_s3 + $0x18] sm:$0xff]  ;;  %s334_s28 = scalar_lea.vmem %s943_s9, %s686_s20 }
   0xe   : > { %382 = vmatpush.msra.mxu0 %v344_v1  ;;  %v336_v4 = vld [vmem:[%s328_s23] sm:$0xff]  ;;  %v337_v5 = vld [vmem:[%s328_s23 + $0x8] sm:$0xff]  ;;  %v338_v10 = vld [vmem:[%s328_s23 + $0x10] sm:$0xff] }
   0xf   : > { %450 = vmatpush.msra.mxu1 %v416_v7  ;;  %v339_v12 = vld [vmem:[%s328_s23 + $0x18] sm:$0xff]  ;;  %v340_v13 = vld [vmem:[%s328_s23 + $0x20] sm:$0xff]  ;;  %v341_v14 = vld [vmem:[%s328_s23 + $0x28] sm:$0xff] }
  0x10   : > { %383 = vmatpush.msra.mxu0 %v343_v2  ;;  %v412_v15 = vld [vmem:[%s937_s3 + $0x10] sm:$0xff]  ;;  %v411_v16 = vld [vmem:[%s937_s3 + $0x8] sm:$0xff]  ;;  %v410_v17 = vld [vmem:[%s937_s3] sm:$0xff] }
  0x11   : > { %451 = vmatpush.msra.mxu1 %v415_v8  ;;  %v722_v18 = vld [vmem:[%s936_s2] ss:$0 sm:$0xff]  ;;  %v489_v25 = vld [vmem:[%s939_s5 + $0x38] sm:$0xff]  ;;  %v488_v26 = vld [vmem:[%s939_s5 + $0x30] sm:$0xff] }
  0x12   : > { %384 = vmatpush.msra.mxu0 %v342_v3  ;;  %520 = vmatpush.msra.mxu2 %v489_v25  ;;  %v487_v27 = vld [vmem:[%s939_s5 + $0x28] sm:$0xff]  ;;  %v486_v30 = vld [vmem:[%s939_s5 + $0x20] sm:$0xff]  ;;  %v485_v32 = vld [vmem:[%s939_s5 + $0x18] sm:$0xff] }
  0x13   : > { %688 = vmatmul.msk.f32.vlgmr.msra.gmra.mxu0 %vm350_vm0, %v336_v4  ;;  %452 = vmatpush.msra.mxu1 %v414_v9  ;;  %v484_v42 = vld [vmem:[%s939_s5 + $0x10] sm:$0xff]  ;;  %v483_v43 = vld [vmem:[%s939_s5 + $0x8] sm:$0xff]  ;;  %v482_v44 = vld [vmem:[%s939_s5] sm:$0xff] }
  0x14   : > { %521 = vmatpush.msra.mxu2 %v488_v26  ;;  %v723_v45 = vld [vmem:[%s938_s4] ss:$0 sm:$0xff]  ;;  %v560_v52 = vld [vmem:[%s941_s7 + $0x38] sm:$0xff]  ;;  %v559_v53 = vld [vmem:[%s941_s7 + $0x30] sm:$0xff] }
  0x15   : > { %453 = vmatpush.msra.mxu1 %v413_v11  ;;  %591 = vmatpush.msra.mxu3 %v560_v52  ;;  %v558_v54 = vld [vmem:[%s941_s7 + $0x28] sm:$0xff]  ;;  %v557_v57 = vld [vmem:[%s941_s7 + $0x20] sm:$0xff]  ;;  %v556_v59 = vld [vmem:[%s941_s7 + $0x18] sm:$0xff] }
  0x16   : > { %522 = vmatpush.msra.mxu2 %v487_v27  ;;  %v554_v6 = vld [vmem:[%s941_s7 + $0x8] sm:$0xff]  ;;  %v553_v7 = vld [vmem:[%s941_s7] sm:$0xff] }
  0x17   : > { %454 = vmatpush.msra.mxu1 %v412_v15  ;;  %592 = vmatpush.msra.mxu3 %v559_v53  ;;  %v724_v8 = vld [vmem:[%s940_s6] ss:$0 sm:$0xff] }
  0x18   : > { %523 = vmatpush.msra.mxu2 %v486_v30  ;;  %v725_v27 = vld [vmem:[%s942_s8] ss:$0 sm:$0xff] }
  0x19   : > { %455 = vmatpush.msra.mxu1 %v411_v16  ;;  %593 = vmatpush.msra.mxu3 %v558_v54 }
  0x1a   : > { %524 = vmatpush.msra.mxu2 %v485_v32 }
  0x1b   : > { %689 = vmatmul.msk.f32.gmra.mxu0 %vm350_vm0, %v337_v5  ;;  %456 = vmatpush.msra.mxu1 %v410_v17  ;;  %v555_v5 = vld [vmem:[%s941_s7 + $0x10] sm:$0xff] }
  0x1c   : > { %525 = vmatpush.msra.mxu2 %v484_v42  ;;  %594 = vmatpush.msra.mxu3 %v557_v57 }
  0x1e   : > { %526 = vmatpush.msra.mxu2 %v483_v43  ;;  %595 = vmatpush.msra.mxu3 %v556_v59 }
  0x20   : > { %527 = vmatpush.msra.mxu2 %v482_v44  ;;  %596 = vmatpush.msra.mxu3 %v555_v5 }
  0x22   : > { %597 = vmatpush.msra.mxu3 %v554_v6 }
  0x23   : > { %690 = vmatmul.msk.f32.gmra.mxu0 %vm350_vm0, %v338_v10 }
  0x24   : > { %598 = vmatpush.msra.mxu3 %v553_v7 }
  0x2b   : > { %691 = vmatmul.msk.f32.gmra.mxu0 %vm350_vm0, %v339_v12 }
  0x33   : > { %692 = vmatmul.msk.f32.gmra.mxu0 %vm350_vm0, %v340_v13 }
  0x3b   : > { %693 = vmatmul.msk.f32.gmra.mxu0 %vm350_vm0, %v341_v14 }
  0x90   : > { %v386_v19 = vpop.f32.mrf.mxu0 }
  0x91   : > { %v387_v20 = vadd.f32 %v722_v18, %v386_v19 }
  0x93   : > { %v404_v21 = vmax.f32 %v387_v20, 0.0 }
  0x95   : > { %694 = vmatmul.msk.f32.vlgmr.msra.gmra.mxu1 %vm422_vm1, %v404_v21 }
  0x98   : > { %v389_v22 = vpop.f32.mrf.mxu0 }
  0x99   : > { %v390_v23 = vadd.f32 %v722_v18, %v389_v22 }
  0x9b   : > { %v405_v24 = vmax.f32 %v390_v23, 0.0 }
  0x9d   : > { %695 = vmatmul.msk.f32.gmra.mxu1 %vm422_vm1, %v405_v24 }
  0xa0   : > { %v392_v28 = vpop.f32.mrf.mxu0 }
  0xa1   : > { %v393_v29 = vadd.f32 %v722_v18, %v392_v28 }
  0xa3   : > { %v406_v31 = vmax.f32 %v393_v29, 0.0 }
  0xa5   : > { %696 = vmatmul.msk.f32.gmra.mxu1 %vm422_vm1, %v406_v31 }
  0xa8   : > { %v395_v33 = vpop.f32.mrf.mxu0 }
  0xa9   : > { %v396_v34 = vadd.f32 %v722_v18, %v395_v33 }
  0xab   : > { %v407_v35 = vmax.f32 %v396_v34, 0.0 }
  0xad   : > { %697 = vmatmul.msk.f32.gmra.mxu1 %vm422_vm1, %v407_v35 }
  0xb0   : > { %v398_v36 = vpop.f32.mrf.mxu0 }
  0xb1   : > { %v399_v37 = vadd.f32 %v722_v18, %v398_v36 }
  0xb3   : > { %v408_v38 = vmax.f32 %v399_v37, 0.0 }
  0xb5   : > { %698 = vmatmul.msk.f32.gmra.mxu1 %vm422_vm1, %v408_v38 }
  0xb8   : > { %v401_v39 = vpop.f32.mrf.mxu0 }
  0xb9   : > { %v402_v40 = vadd.f32 %v722_v18, %v401_v39 }
  0xbb   : > { %v409_v41 = vmax.f32 %v402_v40, 0.0 }
  0xbd   : > { %699 = vmatmul.msk.f32.gmra.mxu1 %vm422_vm1, %v409_v41 }
 0x112   : > { %v458_v46 = vpop.f32.mrf.mxu1 }
 0x113   : > { %v459_v47 = vadd.f32 %v723_v45, %v458_v46 }
 0x115   : > { %v476_v48 = vmax.f32 %v459_v47, 0.0 }
 0x117   : > { %700 = vmatmul.msk.f32.vlgmr.msra.gmra.mxu2 %vm422_vm1, %v476_v48 }
 0x11a   : > { %v461_v49 = vpop.f32.mrf.mxu1 }
 0x11b   : > { %v462_v50 = vadd.f32 %v723_v45, %v461_v49 }
 0x11d   : > { %v477_v51 = vmax.f32 %v462_v50, 0.0 }
 0x11f   : > { %701 = vmatmul.msk.f32.gmra.mxu2 %vm422_vm1, %v477_v51 }
 0x122   : > { %v464_v55 = vpop.f32.mrf.mxu1 }
 0x123   : > { %v465_v56 = vadd.f32 %v723_v45, %v464_v55 }
 0x125   : > { %v478_v58 = vmax.f32 %v465_v56, 0.0 }
 0x127   : > { %702 = vmatmul.msk.f32.gmra.mxu2 %vm422_vm1, %v478_v58 }
 0x12a   : > { %v467_v60 = vpop.f32.mrf.mxu1 }
 0x12b   : > { %v468_v61 = vadd.f32 %v723_v45, %v467_v60 }
 0x12d   : > { %v479_v62 = vmax.f32 %v468_v61, 0.0 }
 0x12f   : > { %703 = vmatmul.msk.f32.gmra.mxu2 %vm422_vm1, %v479_v62 }
 0x132   : > { %v470_v63 = vpop.f32.mrf.mxu1 }
 0x133   : > { %v471_v0 = vadd.f32 %v723_v45, %v470_v63 }
 0x135   : > { %v480_v1 = vmax.f32 %v471_v0, 0.0 }
 0x137   : > { %704 = vmatmul.msk.f32.gmra.mxu2 %vm422_vm1, %v480_v1 }
 0x13a   : > { %v473_v2 = vpop.f32.mrf.mxu1 }
 0x13b   : > { %v474_v3 = vadd.f32 %v723_v45, %v473_v2 }
 0x13d   : > { %v481_v4 = vmax.f32 %v474_v3, 0.0 }
 0x13f   : > { %705 = vmatmul.msk.f32.gmra.mxu2 %vm422_vm1, %v481_v4 }
 0x19a   : > { %v529_v9 = vpop.f32.mrf.mxu2 }
 0x19b   : > { %v530_v10 = vadd.f32 %v724_v8, %v529_v9 }
 0x19d   : > { %v547_v11 = vmax.f32 %v530_v10, 0.0 }
 0x19f   : > { %706 = vmatmul.msk.f32.vlgmr.msra.gmra.mxu3 %vm422_vm1, %v547_v11 }
 0x1a2   : > { %v532_v12 = vpop.f32.mrf.mxu2 }
 0x1a3   : > { %v533_v13 = vadd.f32 %v724_v8, %v532_v12 }
 0x1a5   : > { %v548_v14 = vmax.f32 %v533_v13, 0.0 }
 0x1a7   : > { %707 = vmatmul.msk.f32.gmra.mxu3 %vm422_vm1, %v548_v14 }
 0x1aa   : > { %v535_v15 = vpop.f32.mrf.mxu2 }
 0x1ab   : > { %v536_v16 = vadd.f32 %v724_v8, %v535_v15 }
 0x1ad   : > { %v549_v17 = vmax.f32 %v536_v16, 0.0 }
 0x1af   : > { %708 = vmatmul.msk.f32.gmra.mxu3 %vm422_vm1, %v549_v17 }
 0x1b2   : > { %v538_v18 = vpop.f32.mrf.mxu2 }
 0x1b3   : > { %v539_v19 = vadd.f32 %v724_v8, %v538_v18 }
 0x1b5   : > { %v550_v20 = vmax.f32 %v539_v19, 0.0 }
 0x1b7   : > { %709 = vmatmul.msk.f32.gmra.mxu3 %vm422_vm1, %v550_v20 }
 0x1ba   : > { %v541_v21 = vpop.f32.mrf.mxu2 }
 0x1bb   : > { %v542_v22 = vadd.f32 %v724_v8, %v541_v21 }
 0x1bd   : > { %v551_v23 = vmax.f32 %v542_v22, 0.0 }
 0x1bf   : > { %710 = vmatmul.msk.f32.gmra.mxu3 %vm422_vm1, %v551_v23 }
 0x1c2   : > { %v544_v24 = vpop.f32.mrf.mxu2 }
 0x1c3   : > { %v545_v25 = vadd.f32 %v724_v8, %v544_v24 }
 0x1c5   : > { %v552_v26 = vmax.f32 %v545_v25, 0.0 }
 0x1c7   : > { %711 = vmatmul.msk.f32.gmra.mxu3 %vm422_vm1, %v552_v26 }
 0x222   : > { %v600_v28 = vpop.f32.mrf.mxu3 }
 0x223   : > { %v601_v29 = vadd.f32 %v725_v27, %v600_v28 }
 0x225   : > { %619 = vst.msk [vmem:[%s334_s28] sm:$0xff] %vm618_vm2, %v601_v29 }
 0x22a   : > { %v603_v30 = vpop.f32.mrf.mxu3 }
 0x22b   : > { %v604_v31 = vadd.f32 %v725_v27, %v603_v30 }
 0x22d   : > { %620 = vst.msk [vmem:[%s334_s28 + $0x8] sm:$0xff] %vm618_vm2, %v604_v31 }
 0x232   : > { %v606_v32 = vpop.f32.mrf.mxu3 }
 0x233   : > { %v607_v33 = vadd.f32 %v725_v27, %v606_v32 }
 0x235   : > { %621 = vst.msk [vmem:[%s334_s28 + $0x10] sm:$0xff] %vm618_vm2, %v607_v33 }
 0x23a   : > { %v609_v34 = vpop.f32.mrf.mxu3 }
 0x23b   : > { %v610_v35 = vadd.f32 %v725_v27, %v609_v34 }
 0x23d   : > { %622 = vst.msk [vmem:[%s334_s28 + $0x18] sm:$0xff] %vm618_vm2, %v610_v35 }
 0x242   : > { %v612_v36 = vpop.f32.mrf.mxu3 }
 0x243   : > { %v613_v37 = vadd.f32 %v725_v27, %v612_v36 }
 0x245   : > { %623 = vst.msk [vmem:[%s334_s28 + $0x20] sm:$0xff] %vm618_vm2, %v613_v37 }
 0x24a   : > { %v615_v38 = vpop.f32.mrf.mxu3 }
 0x24b   : > { %v616_v39 = vadd.f32 %v725_v27, %v615_v38 }
 0x24d   : > { %624 = vst.msk [vmem:[%s334_s28 + $0x28] sm:$0xff] %vm618_vm2, %v616_v39 }
 0x24e PF: > { %s19_s30 = sadd.s32 1, %s732_s30  }
 0x24f   : > { %p16_p4 = scmp.ge.s32.totalorder %s19_s30, 4  }
 0x251   :  { %18 = sbr.rel (!%p16_p4) target bundleno = 1 (0x1), region = 86 }

</bundles_post_ra>
